<compile_context>
chip_gen: v5e
topology: v5e:2x2
jax: 0.10.0
libtpu: 0.0.40
codegen_flags: <defaults>
</compile_context>

<pallas_src>
import jax
import jax.numpy as jnp
from jax.experimental import pallas as pl
from jax.experimental.pallas import tpu as pltpu


OUT_W = 8       # packed output width: cols 0-1 = main_output, cols 2-3 = asr_output
GATE_COL = 4    # spare column of wc_pack carrying the audio half of the gate logit diff


def _round_up(x, m):
    return (x + m - 1) // m * m


def _pick_tb(batch, max_tb=512, min_tiles=4):
    """Batch-tile size: multiple of 16 (bf16 sublane tiling), <= max_tb, aiming
    for >= min_tiles grid steps (pipelining + both v7x TensorCores) while
    bounding round_up(batch, tb) padding waste."""
    tiles = max(min_tiles, -(-batch // max_tb))
    tb = -(-batch // tiles)
    return max(16, min(max_tb, _round_up(tb, 16)))


def _vmem_limit_bytes(tb, h_txt, c_aud, d_asr, d_aud):
    """Estimate scoped-VMEM need (double-buffered act/out tiles + weights) and
    pick a limit: floored at 32 MiB (raises v5e's 16 MiB default), capped well
    under v7x's 64 MiB physical VMEM."""
    bf16_b, f32_b = 2, 4
    acts = 2 * tb * (h_txt + c_aud) * bf16_b
    outs = 2 * tb * OUT_W * f32_b
    wts = 2 * bf16_b * (h_txt * d_asr + c_aud * d_aud + d_aud * OUT_W
                        + d_asr * (d_asr + 1) + d_asr * d_asr + d_asr * OUT_W)
    bias = 2 * f32_b * (2 * d_asr + d_aud + (d_asr + 1) + 5 * OUT_W)
    est = acts + outs + wts + bias
    return int(min(max(2 * est + (8 << 20), 32 << 20), 56 << 20))


# ----------------------------------------------------------------------------
# Fused multimodal head kernel (one batch tile per grid step)
#   asr_emb   = tanh(text_pool @ wp + bp)              (BERT-pooler stub tail)
#   aud_emb   = relu(audio_pool @ wa + ba)             (mobilenet embedding tail)
#   main_in   = aud_emb @ wc + bc                      (mobilenet classifier)
#   asr_out   = L3(relu(L2(relu(L1(asr_emb)))))        (asr_model MLP)
#   gate      = softmax(Lg(concat(asr_emb, aud_emb)))  == sigmoid(logit diff)
#   main_out  = main_in * gate[:,0] + asr_out * gate[:,1]
# Gate folding:
#   main_wide[:, GATE_COL] = aud_emb @ (wg_aud[:,0]-wg_aud[:,1]) + (bg0-bg1)
#   pre1[:, d_asr]         = asr_emb @ (wg_asr[:,0]-wg_asr[:,1])   (pre-ReLU col)
# Output slab cols 0-1 = main_out, cols 2-3 = asr_out, cols 4-7 = junk/zero.
# ----------------------------------------------------------------------------
def fused_multimodal_head_kernel(
        text_pool_ref, audio_pool_ref,
        wp_ref, bp_ref, wa_ref, ba_ref,
        wc_ref, bc_ref,
        w1_ref, b1_ref, w2_ref, b2_ref, w3_ref, b3_ref,
        masks_ref,
        out_ref):
    f32 = jnp.float32
    bf16 = jnp.bfloat16
    d_asr = w2_ref.shape[0]

    # Upstream stub tails fused in-kernel (bf16 operands, f32 accumulation).
    asr_emb = jnp.tanh(
        jnp.dot(text_pool_ref[...], wp_ref[...], preferred_element_type=f32)
        + bp_ref[...])
    aud_emb = jnp.maximum(
        jnp.dot(audio_pool_ref[...], wa_ref[...], preferred_element_type=f32)
        + ba_ref[...], 0.0)
    asr_emb_b = asr_emb.astype(bf16)
    aud_emb_b = aud_emb.astype(bf16)

    # mobilenet classifier head; wc_pack cols 0-1 = real classifier, col
    # GATE_COL = audio half of the gate logit difference (+ its bias).
    main_wide = (jnp.dot(aud_emb_b, wc_ref[...], preferred_element_type=f32)
                 + bc_ref[...])                                   # (TB, OUT_W)

    # asr_model MLP layer 1 with the asr half of the gate logit difference
    # folded as an extra column (read before the ReLU).
    pre1 = (jnp.dot(asr_emb_b, w1_ref[...], preferred_element_type=f32)
            + b1_ref[...])                                        # (TB, d_asr+1)
    h = jnp.maximum(pre1[:, :d_asr], 0.0).astype(bf16)
    gate_asr = pre1[:, d_asr:d_asr + 1]                           # (TB, 1)

    h = jnp.maximum(
        jnp.dot(h, w2_ref[...], preferred_element_type=f32) + b2_ref[...], 0.0
    ).astype(bf16)
    # w3_pack duplicates asr_output into cols 0-1 AND cols 2-3 of the slab.
    asr_wide = (jnp.dot(h, w3_ref[...], preferred_element_type=f32)
                + b3_ref[...])                                    # (TB, OUT_W)

    # Gate: softmax over 2 logits == sigmoid of the logit difference.
    d = gate_asr + main_wide[:, GATE_COL:GATE_COL + 1]            # (TB, 1)
    g_main = jax.nn.sigmoid(d)                                    # weight for main branch
    g_asr = 1.0 - g_main                                          # weight for asr branch

    m01 = masks_ref[0:1, :]   # ones on cols 0-1
    m23 = masks_ref[1:2, :]   # ones on cols 2-3
    # cols 0-1: main_in*g_main + asr_out*g_asr ; cols 2-3: asr_out (pre-gating);
    # col GATE_COL: junk (never read back); rest: zero.
    out_ref[...] = (main_wide * g_main
                    + asr_wide * (g_asr * m01 + m23)).astype(out_ref.dtype)


def fused_head(text_pool, audio_pool, params):
    """Runs the fused head. Returns (main_output, asr_output), each [B, 2] f32."""
    f32, bf16 = jnp.float32, jnp.bfloat16
    B, h_txt = text_pool.shape
    c_aud = audio_pool.shape[1]
    d_asr = params["wp"].shape[1]
    d_aud = params["wa"].shape[1]

    tb = _pick_tb(B)
    b_pad = _round_up(B, tb)
    grid = (b_pad // tb,)

    # Activations: bf16 for the HBM->VMEM DMA (f32 accumulation in-kernel).
    text_pool = text_pool.astype(bf16)
    audio_pool = audio_pool.astype(bf16)
    if b_pad != B:
        text_pool = jnp.pad(text_pool, ((0, b_pad - B), (0, 0)))
        audio_pool = jnp.pad(audio_pool, ((0, b_pad - B), (0, 0)))

    # Derived / repacked parameters (tiny host-side XLA ops).
    # wc_pack: cols 0-1 = classifier, col GATE_COL = wg_aud[:,0]-wg_aud[:,1].
    wc_pack = jnp.zeros((d_aud, OUT_W), f32)
    wc_pack = wc_pack.at[:, 0:2].set(params["wc"].astype(f32))
    wc_pack = wc_pack.at[:, GATE_COL].set(
        (params["wg_aud"][:, 0] - params["wg_aud"][:, 1]).astype(f32))
    bc_pack = jnp.zeros((1, OUT_W), f32)
    bc_pack = bc_pack.at[:, 0:2].set(params["bc"].reshape(1, 2).astype(f32))
    bc_pack = bc_pack.at[:, GATE_COL].set(
        (params["bg"][:, 0] - params["bg"][:, 1]).astype(f32))
    # w1_ext: extra trailing column = wg_asr[:,0]-wg_asr[:,1] (read pre-ReLU).
    wgd_asr = (params["wg_asr"][:, 0] - params["wg_asr"][:, 1]).astype(f32)
    w1_ext = jnp.concatenate([params["w1"].astype(f32), wgd_asr[:, None]], axis=1)
    b1_ext = jnp.concatenate([params["b1"].reshape(1, d_asr).astype(f32),
                              jnp.zeros((1, 1), f32)], axis=1)
    # w3_pack: asr_output lands in BOTH cols 0-1 and 2-3 of the slab.
    w3 = params["w3"].astype(f32)
    b3 = params["b3"].reshape(1, 2).astype(f32)
    w3_pack = jnp.zeros((d_asr, OUT_W), f32).at[:, 0:2].set(w3).at[:, 2:4].set(w3)
    b3_pack = jnp.zeros((1, OUT_W), f32).at[:, 0:2].set(b3).at[:, 2:4].set(b3)
    # Epilogue masks (row 0: cols 0-1, row 1: cols 2-3), precomputed once.
    masks = jnp.zeros((2, OUT_W), f32).at[0, 0:2].set(1.0).at[1, 2:4].set(1.0)

    # Activations: tiled along the batch grid.  Weights: index_map always (0,0)
    # so they stay VMEM-resident and are not re-DMA'd per grid step.
    act = lambda d: pl.BlockSpec((tb, d), lambda i: (i, 0))
    res = lambda shape: pl.BlockSpec(shape, lambda i: (0, 0))

    slab = pl.pallas_call(
        fused_multimodal_head_kernel,
        out_shape=jax.ShapeDtypeStruct((b_pad, OUT_W), f32),
        grid_spec=pltpu.PrefetchScalarGridSpec(
            num_scalar_prefetch=0,
            grid=grid,
            in_specs=[
                act(h_txt), act(c_aud),
                res((h_txt, d_asr)), res((1, d_asr)),
                res((c_aud, d_aud)), res((1, d_aud)),
                res((d_aud, OUT_W)), res((1, OUT_W)),
                res((d_asr, d_asr + 1)), res((1, d_asr + 1)),
                res((d_asr, d_asr)), res((1, d_asr)),
                res((d_asr, OUT_W)), res((1, OUT_W)),
                res((2, OUT_W)),
            ],
            out_specs=pl.BlockSpec((tb, OUT_W), lambda i: (i, 0)),
        ),
        compiler_params=pltpu.CompilerParams(
            dimension_semantics=("parallel",),   # shard batch tiles across TCs (v7x)
            vmem_limit_bytes=_vmem_limit_bytes(tb, h_txt, c_aud, d_asr, d_aud),
        ),
    )(
        text_pool, audio_pool,
        params["wp"].astype(bf16), params["bp"].reshape(1, d_asr).astype(f32),
        params["wa"].astype(bf16), params["ba"].reshape(1, d_aud).astype(f32),
        wc_pack.astype(bf16), bc_pack,
        w1_ext.astype(bf16), b1_ext,
        params["w2"].astype(bf16), params["b2"].reshape(1, d_asr).astype(f32),
        w3_pack.astype(bf16), b3_pack,
        masks,
    )
    main_output = slab[:B, 0:2]
    asr_output = slab[:B, 2:4]
    return main_output, asr_output


# ----------------------------------------------------------------------------
# Glue stubs for external sub-modules (definitions not provided in the source).
# Only the pooling front-ends remain outside the kernel; their tail Linears are
# fused into the Pallas kernel above.
# ----------------------------------------------------------------------------
def asr_text_pool_stub(tokens, segment_ids, attention_mask, p):
    # TODO(synk): TextBertEmbeddingModel (full BERT encoder) is not defined in
    # the source file; replaced by embedding lookup + masked mean pooling.
    tok_e = p["tok_table"][tokens] + p["seg_table"][segment_ids]      # [B, S, H]
    mask = attention_mask.astype(jnp.float32)[..., None]              # [B, S, 1]
    return (tok_e * mask).sum(axis=1) / jnp.maximum(mask.sum(axis=1), 1.0)


def audio_pool_stub(audio):
    # TODO(synk): mobilenet_v2(2, False) backbone is not defined in the source
    # file; replaced by NCHW global average pooling.
    return audio.mean(axis=(2, 3))                                     # [B, C]


def output_gate_merge_multimodel(tokens, segment_ids, attention_mask, audio, params):
    text_pool = asr_text_pool_stub(tokens, segment_ids, attention_mask, params)
    audio_pool = audio_pool_stub(audio)
    return fused_head(text_pool.astype(jnp.float32),
                      audio_pool.astype(jnp.float32), params)


# ----------------------------------------------------------------------------
# Pure-JAX reference of the fused head (mirrors the torch module's forward).
# ----------------------------------------------------------------------------
def reference_head(text_pool, audio_pool, p):
    asr_emb = jnp.tanh(text_pool @ p["wp"] + p["bp"])
    aud_emb = jax.nn.relu(audio_pool @ p["wa"] + p["ba"])
    main_in = aud_emb @ p["wc"] + p["bc"].reshape(1, 2)
    h = jax.nn.relu(asr_emb @ p["w1"] + p["b1"])
    h = jax.nn.relu(h @ p["w2"] + p["b2"])
    asr_out = h @ p["w3"] + p["b3"]
    logits = (jnp.concatenate([asr_emb, aud_emb], axis=1)
              @ jnp.concatenate([p["wg_asr"], p["wg_aud"]], axis=0) + p["bg"])
    gate = jax.nn.softmax(logits, axis=1)
    main_out = main_in * gate[:, 0:1] + asr_out * gate[:, 1:2]
    return main_out, asr_out


# ----------------------------------------------------------------------------
# Deterministic parameter init + example run
# ----------------------------------------------------------------------------
def make_params(key, vocab, hidden, d_asr, d_aud, c_in):
    ks = jax.random.split(key, 16)
    u = lambda k, s, lim: jax.random.uniform(k, s, jnp.float32, -lim, lim)
    return {
        # BERT stub (lookup tables used in glue; wp/bp fused into kernel)
        "tok_table": u(ks[0], (vocab, hidden), 0.1),
        "seg_table": u(ks[1], (2, hidden), 0.1),
        "wp": u(ks[2], (hidden, d_asr), 0.2),
        "bp": jnp.zeros((1, d_asr), jnp.float32),
        # mobilenet stub tail (fused into kernel)
        "wa": u(ks[3], (c_in, d_aud), 0.3),
        "ba": jnp.zeros((1, d_aud), jnp.float32),
        "wc": u(ks[4], (d_aud, 2), 0.3),
        "bc": jnp.zeros((1, 2), jnp.float32),
        # asr_model MLP (weights stored as [in, out], biases as [1, out])
        "w1": u(ks[5], (d_asr, d_asr), 0.2),
        "b1": u(ks[6], (1, d_asr), 0.1),
        "w2": u(ks[7], (d_asr, d_asr), 0.2),
        "b2": u(ks[8], (1, d_asr), 0.1),
        "w3": u(ks[9], (d_asr, 2), 0.2),
        "b3": u(ks[10], (1, 2), 0.1),
        # gate Linear over concat(asr_emb, audio_emb): rows split as [Wg_asr ; Wg_aud]
        "wg_asr": u(ks[11], (d_asr, 2), 0.2),
        "wg_aud": u(ks[12], (d_aud, 2), 0.2),
        "bg": u(ks[13], (1, 2), 0.1),
    }


if __name__ == "__main__":
    key = jax.random.PRNGKey(0)
    B, S, VOCAB, HIDDEN = 2, 8, 100, 32
    D_ASR, D_AUD = 32, 32
    C, H, W = 4, 16, 16

    k0, k1, k2 = jax.random.split(key, 3)
    params = make_params(k0, VOCAB, HIDDEN, D_ASR, D_AUD, C)

    tokens = jax.random.randint(k1, (B, S), 0, VOCAB)
    segment_ids = jnp.zeros((B, S), jnp.int32)
    attention_mask = jnp.ones((B, S), jnp.int32)
    audio = jax.random.normal(k2, (B, C, H, W), jnp.float32)   # NCHW

    fwd = jax.jit(output_gate_merge_multimodel)
    main_output, asr_output = fwd(tokens, segment_ids, attention_mask, audio, params)
    jax.block_until_ready((main_output, asr_output))

    # Reference check (loose tolerance: bf16 matmul operands, f32 accumulation).
    text_pool = asr_text_pool_stub(tokens, segment_ids, attention_mask, params)
    audio_pool = audio_pool_stub(audio)
    ref_main, ref_asr = reference_head(text_pool.astype(jnp.float32),
                                       audio_pool.astype(jnp.float32), params)

    assert main_output.shape == (B, 2) and asr_output.shape == (B, 2)
    assert bool(jnp.all(jnp.isfinite(main_output)))
    assert bool(jnp.all(jnp.isfinite(asr_output)))
    assert bool(jnp.allclose(main_output, ref_main, rtol=5e-2, atol=5e-2))
    assert bool(jnp.allclose(asr_output, ref_asr, rtol=5e-2, atol=5e-2))
    print("KERNEL_OK")
</pallas_src>

<mosaic_0001>
module attributes {stable_mosaic.version = 11 : i64} {
  func.func @fused_multimodal_head_kernel(%arg0: i32, %arg1: memref<16x32xbf16, #tpu.memory_space<vmem>>, %arg2: memref<16x4xbf16, #tpu.memory_space<vmem>>, %arg3: memref<32x32xbf16, #tpu.memory_space<vmem>>, %arg4: memref<1x32xf32, #tpu.memory_space<vmem>>, %arg5: memref<4x32xbf16, #tpu.memory_space<vmem>>, %arg6: memref<1x32xf32, #tpu.memory_space<vmem>>, %arg7: memref<32x8xbf16, #tpu.memory_space<vmem>>, %arg8: memref<1x8xf32, #tpu.memory_space<vmem>>, %arg9: memref<32x33xbf16, #tpu.memory_space<vmem>>, %arg10: memref<1x33xf32, #tpu.memory_space<vmem>>, %arg11: memref<32x32xbf16, #tpu.memory_space<vmem>>, %arg12: memref<1x32xf32, #tpu.memory_space<vmem>>, %arg13: memref<32x8xbf16, #tpu.memory_space<vmem>>, %arg14: memref<1x8xf32, #tpu.memory_space<vmem>>, %arg15: memref<2x8xf32, #tpu.memory_space<vmem>>, %arg16: memref<16x8xf32, #tpu.memory_space<vmem>>) attributes {dimension_semantics = [#tpu.dimension_semantics<parallel>], iteration_bounds = array<i64: 1>, scalar_prefetch = 0 : i64, scratch_operands = 0 : i64, tpu.core_type = #tpu.core_type<tc>, window_params = [{transform_indices = @transform_0, window_bounds = array<i64: 16, 32>}, {transform_indices = @transform_1, window_bounds = array<i64: 16, 4>}, {pipeline_mode = #tpu.pipeline_mode<synchronous>, transform_indices = @transform_2, window_bounds = array<i64: 32, 32>}, {pipeline_mode = #tpu.pipeline_mode<synchronous>, transform_indices = @transform_3, window_bounds = array<i64: 1, 32>}, {pipeline_mode = #tpu.pipeline_mode<synchronous>, transform_indices = @transform_4, window_bounds = array<i64: 4, 32>}, {pipeline_mode = #tpu.pipeline_mode<synchronous>, transform_indices = @transform_5, window_bounds = array<i64: 1, 32>}, {pipeline_mode = #tpu.pipeline_mode<synchronous>, transform_indices = @transform_6, window_bounds = array<i64: 32, 8>}, {pipeline_mode = #tpu.pipeline_mode<synchronous>, transform_indices = @transform_7, window_bounds = array<i64: 1, 8>}, {pipeline_mode = #tpu.pipeline_mode<synchronous>, transform_indices = @transform_8, window_bounds = array<i64: 32, 33>}, {pipeline_mode = #tpu.pipeline_mode<synchronous>, transform_indices = @transform_9, window_bounds = array<i64: 1, 33>}, {pipeline_mode = #tpu.pipeline_mode<synchronous>, transform_indices = @transform_10, window_bounds = array<i64: 32, 32>}, {pipeline_mode = #tpu.pipeline_mode<synchronous>, transform_indices = @transform_11, window_bounds = array<i64: 1, 32>}, {pipeline_mode = #tpu.pipeline_mode<synchronous>, transform_indices = @transform_12, window_bounds = array<i64: 32, 8>}, {pipeline_mode = #tpu.pipeline_mode<synchronous>, transform_indices = @transform_13, window_bounds = array<i64: 1, 8>}, {pipeline_mode = #tpu.pipeline_mode<synchronous>, transform_indices = @transform_14, window_bounds = array<i64: 2, 8>}, {transform_indices = @transform_15, window_bounds = array<i64: 16, 8>}]} {
    %c0 = arith.constant 0 : index
    %c0_0 = arith.constant 0 : index
    %0 = vector.load %arg1[%c0, %c0_0] : memref<16x32xbf16, #tpu.memory_space<vmem>>, vector<16x32xbf16>
    %c0_1 = arith.constant 0 : index
    %c0_2 = arith.constant 0 : index
    %1 = vector.load %arg3[%c0_1, %c0_2] : memref<32x32xbf16, #tpu.memory_space<vmem>>, vector<32x32xbf16>
    %cst = arith.constant dense<0.000000e+00> : vector<16x32xf32>
    %2 = tpu.matmul %0, %1, %cst {dimension_numbers = #tpu.dot_dimension_numbers<[1], [0], [0], [1], [0, 0, 1, 1], [], []>} : vector<16x32xbf16>, vector<32x32xbf16>, vector<16x32xf32> -> vector<16x32xf32>
    %c0_3 = arith.constant 0 : index
    %c0_4 = arith.constant 0 : index
    %3 = vector.load %arg4[%c0_3, %c0_4] : memref<1x32xf32, #tpu.memory_space<vmem>>, vector<1x32xf32>
    %4 = vector.broadcast %3 : vector<1x32xf32> to vector<16x32xf32>
    %5 = arith.addf %2, %4 : vector<16x32xf32>
    %6 = math.tanh %5 : vector<16x32xf32>
    %c0_5 = arith.constant 0 : index
    %c0_6 = arith.constant 0 : index
    %7 = vector.load %arg2[%c0_5, %c0_6] : memref<16x4xbf16, #tpu.memory_space<vmem>>, vector<16x4xbf16>
    %c0_7 = arith.constant 0 : index
    %c0_8 = arith.constant 0 : index
    %8 = vector.load %arg5[%c0_7, %c0_8] : memref<4x32xbf16, #tpu.memory_space<vmem>>, vector<4x32xbf16>
    %cst_9 = arith.constant dense<0.000000e+00> : vector<16x32xf32>
    %9 = tpu.matmul %7, %8, %cst_9 {dimension_numbers = #tpu.dot_dimension_numbers<[1], [0], [0], [1], [0, 0, 1, 1], [], []>} : vector<16x4xbf16>, vector<4x32xbf16>, vector<16x32xf32> -> vector<16x32xf32>
    %c0_10 = arith.constant 0 : index
    %c0_11 = arith.constant 0 : index
    %10 = vector.load %arg6[%c0_10, %c0_11] : memref<1x32xf32, #tpu.memory_space<vmem>>, vector<1x32xf32>
    %11 = vector.broadcast %10 : vector<1x32xf32> to vector<16x32xf32>
    %12 = arith.addf %9, %11 : vector<16x32xf32>
    %cst_12 = arith.constant 0.000000e+00 : f32
    %13 = vector.broadcast %cst_12 : f32 to vector<16x32xf32>
    %14 = arith.maximumf %12, %13 : vector<16x32xf32>
    %15 = arith.truncf %6 : vector<16x32xf32> to vector<16x32xbf16>
    %16 = arith.truncf %14 : vector<16x32xf32> to vector<16x32xbf16>
    %c0_13 = arith.constant 0 : index
    %c0_14 = arith.constant 0 : index
    %17 = vector.load %arg7[%c0_13, %c0_14] : memref<32x8xbf16, #tpu.memory_space<vmem>>, vector<32x8xbf16>
    %cst_15 = arith.constant dense<0.000000e+00> : vector<16x8xf32>
    %18 = tpu.matmul %16, %17, %cst_15 {dimension_numbers = #tpu.dot_dimension_numbers<[1], [0], [0], [1], [0, 0, 1, 1], [], []>} : vector<16x32xbf16>, vector<32x8xbf16>, vector<16x8xf32> -> vector<16x8xf32>
    %c0_16 = arith.constant 0 : index
    %c0_17 = arith.constant 0 : index
    %19 = vector.load %arg8[%c0_16, %c0_17] : memref<1x8xf32, #tpu.memory_space<vmem>>, vector<1x8xf32>
    %20 = vector.broadcast %19 : vector<1x8xf32> to vector<16x8xf32>
    %21 = arith.addf %18, %20 : vector<16x8xf32>
    %c0_18 = arith.constant 0 : index
    %c0_19 = arith.constant 0 : index
    %22 = vector.load %arg9[%c0_18, %c0_19] : memref<32x33xbf16, #tpu.memory_space<vmem>>, vector<32x33xbf16>
    %cst_20 = arith.constant dense<0.000000e+00> : vector<16x33xf32>
    %23 = tpu.matmul %15, %22, %cst_20 {dimension_numbers = #tpu.dot_dimension_numbers<[1], [0], [0], [1], [0, 0, 1, 1], [], []>} : vector<16x32xbf16>, vector<32x33xbf16>, vector<16x33xf32> -> vector<16x33xf32>
    %c0_21 = arith.constant 0 : index
    %c0_22 = arith.constant 0 : index
    %24 = vector.load %arg10[%c0_21, %c0_22] : memref<1x33xf32, #tpu.memory_space<vmem>>, vector<1x33xf32>
    %25 = vector.broadcast %24 : vector<1x33xf32> to vector<16x33xf32>
    %26 = arith.addf %23, %25 : vector<16x33xf32>
    %27 = vector.extract_strided_slice %26 {offsets = [0, 0], sizes = [16, 32], strides = [1, 1]} : vector<16x33xf32> to vector<16x32xf32>
    %cst_23 = arith.constant 0.000000e+00 : f32
    %28 = vector.broadcast %cst_23 : f32 to vector<16x32xf32>
    %29 = arith.maximumf %27, %28 : vector<16x32xf32>
    %30 = arith.truncf %29 : vector<16x32xf32> to vector<16x32xbf16>
    %31 = vector.extract_strided_slice %26 {offsets = [0, 32], sizes = [16, 1], strides = [1, 1]} : vector<16x33xf32> to vector<16x1xf32>
    %c0_24 = arith.constant 0 : index
    %c0_25 = arith.constant 0 : index
    %32 = vector.load %arg11[%c0_24, %c0_25] : memref<32x32xbf16, #tpu.memory_space<vmem>>, vector<32x32xbf16>
    %cst_26 = arith.constant dense<0.000000e+00> : vector<16x32xf32>
    %33 = tpu.matmul %30, %32, %cst_26 {dimension_numbers = #tpu.dot_dimension_numbers<[1], [0], [0], [1], [0, 0, 1, 1], [], []>} : vector<16x32xbf16>, vector<32x32xbf16>, vector<16x32xf32> -> vector<16x32xf32>
    %c0_27 = arith.constant 0 : index
    %c0_28 = arith.constant 0 : index
    %34 = vector.load %arg12[%c0_27, %c0_28] : memref<1x32xf32, #tpu.memory_space<vmem>>, vector<1x32xf32>
    %35 = vector.broadcast %34 : vector<1x32xf32> to vector<16x32xf32>
    %36 = arith.addf %33, %35 : vector<16x32xf32>
    %cst_29 = arith.constant 0.000000e+00 : f32
    %37 = vector.broadcast %cst_29 : f32 to vector<16x32xf32>
    %38 = arith.maximumf %36, %37 : vector<16x32xf32>
    %39 = arith.truncf %38 : vector<16x32xf32> to vector<16x32xbf16>
    %c0_30 = arith.constant 0 : index
    %c0_31 = arith.constant 0 : index
    %40 = vector.load %arg13[%c0_30, %c0_31] : memref<32x8xbf16, #tpu.memory_space<vmem>>, vector<32x8xbf16>
    %cst_32 = arith.constant dense<0.000000e+00> : vector<16x8xf32>
    %41 = tpu.matmul %39, %40, %cst_32 {dimension_numbers = #tpu.dot_dimension_numbers<[1], [0], [0], [1], [0, 0, 1, 1], [], []>} : vector<16x32xbf16>, vector<32x8xbf16>, vector<16x8xf32> -> vector<16x8xf32>
    %c0_33 = arith.constant 0 : index
    %c0_34 = arith.constant 0 : index
    %42 = vector.load %arg14[%c0_33, %c0_34] : memref<1x8xf32, #tpu.memory_space<vmem>>, vector<1x8xf32>
    %43 = vector.broadcast %42 : vector<1x8xf32> to vector<16x8xf32>
    %44 = arith.addf %41, %43 : vector<16x8xf32>
    %45 = vector.extract_strided_slice %21 {offsets = [0, 4], sizes = [16, 1], strides = [1, 1]} : vector<16x8xf32> to vector<16x1xf32>
    %46 = arith.addf %31, %45 : vector<16x1xf32>
    %47 = arith.negf %46 : vector<16x1xf32>
    %48 = math.exp %47 : vector<16x1xf32>
    %cst_35 = arith.constant 1.000000e+00 : f32
    %49 = vector.broadcast %cst_35 : f32 to vector<16x1xf32>
    %50 = arith.addf %49, %48 : vector<16x1xf32>
    %51 = arith.divf %49, %50 : vector<16x1xf32>
    %cst_36 = arith.constant 1.000000e+00 : f32
    %52 = vector.broadcast %cst_36 : f32 to vector<16x1xf32>
    %53 = arith.subf %52, %51 : vector<16x1xf32>
    %c0_37 = arith.constant 0 : index
    %c0_38 = arith.constant 0 : index
    %54 = vector.load %arg15[%c0_37, %c0_38] : memref<2x8xf32, #tpu.memory_space<vmem>>, vector<1x8xf32>
    %c1 = arith.constant 1 : index
    %c0_39 = arith.constant 0 : index
    %55 = vector.load %arg15[%c1, %c0_39] : memref<2x8xf32, #tpu.memory_space<vmem>>, vector<1x8xf32>
    %56 = vector.broadcast %51 : vector<16x1xf32> to vector<16x8xf32>
    %57 = arith.mulf %21, %56 : vector<16x8xf32>
    %58 = vector.broadcast %53 : vector<16x1xf32> to vector<16x8xf32>
    %59 = vector.broadcast %54 : vector<1x8xf32> to vector<16x8xf32>
    %60 = arith.mulf %58, %59 : vector<16x8xf32>
    %61 = vector.broadcast %55 : vector<1x8xf32> to vector<16x8xf32>
    %62 = arith.addf %60, %61 : vector<16x8xf32>
    %63 = arith.mulf %44, %62 : vector<16x8xf32>
    %64 = arith.addf %57, %63 : vector<16x8xf32>
    %c0_40 = arith.constant 0 : index
    %c0_41 = arith.constant 0 : index
    %65 = vector.load %arg16[%c0_40, %c0_41] : memref<16x8xf32, #tpu.memory_space<vmem>>, vector<16x8xf32>
    tpu.vector_store %arg16[%c0_40, %c0_41], %64 {strides = array<i32>} : memref<16x8xf32, #tpu.memory_space<vmem>>, vector<16x8xf32>,
    return
  }
  func.func @transform_0(%arg0: i32) -> (i32, i32) {
    %c0_i32 = arith.constant 0 : i32
    %c0_i32_0 = arith.constant 0 : i32
    return %arg0, %c0_i32 : i32, i32
  }
  func.func @transform_1(%arg0: i32) -> (i32, i32) {
    %c0_i32 = arith.constant 0 : i32
    %c0_i32_0 = arith.constant 0 : i32
    return %arg0, %c0_i32 : i32, i32
  }
  func.func @transform_2(%arg0: i32) -> (i32, i32) {
    %c0_i32 = arith.constant 0 : i32
    %c0_i32_0 = arith.constant 0 : i32
    %c0_i32_1 = arith.constant 0 : i32
    return %c0_i32, %c0_i32_0 : i32, i32
  }
  func.func @transform_3(%arg0: i32) -> (i32, i32) {
    %c0_i32 = arith.constant 0 : i32
    %c0_i32_0 = arith.constant 0 : i32
    %c0_i32_1 = arith.constant 0 : i32
    return %c0_i32, %c0_i32_0 : i32, i32
  }
  func.func @transform_4(%arg0: i32) -> (i32, i32) {
    %c0_i32 = arith.constant 0 : i32
    %c0_i32_0 = arith.constant 0 : i32
    %c0_i32_1 = arith.constant 0 : i32
    return %c0_i32, %c0_i32_0 : i32, i32
  }
  func.func @transform_5(%arg0: i32) -> (i32, i32) {
    %c0_i32 = arith.constant 0 : i32
    %c0_i32_0 = arith.constant 0 : i32
    %c0_i32_1 = arith.constant 0 : i32
    return %c0_i32, %c0_i32_0 : i32, i32
  }
  func.func @transform_6(%arg0: i32) -> (i32, i32) {
    %c0_i32 = arith.constant 0 : i32
    %c0_i32_0 = arith.constant 0 : i32
    %c0_i32_1 = arith.constant 0 : i32
    return %c0_i32, %c0_i32_0 : i32, i32
  }
  func.func @transform_7(%arg0: i32) -> (i32, i32) {
    %c0_i32 = arith.constant 0 : i32
    %c0_i32_0 = arith.constant 0 : i32
    %c0_i32_1 = arith.constant 0 : i32
    return %c0_i32, %c0_i32_0 : i32, i32
  }
  func.func @transform_8(%arg0: i32) -> (i32, i32) {
    %c0_i32 = arith.constant 0 : i32
    %c0_i32_0 = arith.constant 0 : i32
    %c0_i32_1 = arith.constant 0 : i32
    return %c0_i32, %c0_i32_0 : i32, i32
  }
  func.func @transform_9(%arg0: i32) -> (i32, i32) {
    %c0_i32 = arith.constant 0 : i32
    %c0_i32_0 = arith.constant 0 : i32
    %c0_i32_1 = arith.constant 0 : i32
    return %c0_i32, %c0_i32_0 : i32, i32
  }
  func.func @transform_10(%arg0: i32) -> (i32, i32) {
    %c0_i32 = arith.constant 0 : i32
    %c0_i32_0 = arith.constant 0 : i32
    %c0_i32_1 = arith.constant 0 : i32
    return %c0_i32, %c0_i32_0 : i32, i32
  }
  func.func @transform_11(%arg0: i32) -> (i32, i32) {
    %c0_i32 = arith.constant 0 : i32
    %c0_i32_0 = arith.constant 0 : i32
    %c0_i32_1 = arith.constant 0 : i32
    return %c0_i32, %c0_i32_0 : i32, i32
  }
  func.func @transform_12(%arg0: i32) -> (i32, i32) {
    %c0_i32 = arith.constant 0 : i32
    %c0_i32_0 = arith.constant 0 : i32
    %c0_i32_1 = arith.constant 0 : i32
    return %c0_i32, %c0_i32_0 : i32, i32
  }
  func.func @transform_13(%arg0: i32) -> (i32, i32) {
    %c0_i32 = arith.constant 0 : i32
    %c0_i32_0 = arith.constant 0 : i32
    %c0_i32_1 = arith.constant 0 : i32
    return %c0_i32, %c0_i32_0 : i32, i32
  }
  func.func @transform_14(%arg0: i32) -> (i32, i32) {
    %c0_i32 = arith.constant 0 : i32
    %c0_i32_0 = arith.constant 0 : i32
    %c0_i32_1 = arith.constant 0 : i32
    return %c0_i32, %c0_i32_0 : i32, i32
  }
  func.func @transform_15(%arg0: i32) -> (i32, i32) {
    %c0_i32 = arith.constant 0 : i32
    %c0_i32_0 = arith.constant 0 : i32
    return %arg0, %c0_i32 : i32, i32
  }
}

</mosaic_0001>

<bundles_post_ra>
// kernel: output_gate_merge_multimodel.1
= control target key start
LH: loop header
LB: loop body
LE: loop exit
PB: predicated region body
PF: predicated region fallthrough
CT: control target
= control target key end

     0   :  { %vm114_vm0 = vcmask 1041408   ;;  %vm110_vm1 = vcmask 31744   ;;  %vm78_vm2 = vcmask 261120   ;;  %s474_s23 = smov 28   ;;  %v475_v41 = vmov 32   ;;  %s638_s4 = inlined_call_operand.vmem [shape: bf16[4,32], index: 4, kind: input, shape index: {}]   ;;  %s639_s2 = inlined_call_operand.vmem [shape: bf16[32,32], index: 2, kind: input, shape index: {}]   ;;  %s640_s1 = inlined_call_operand.vmem [shape: bf16[16,4], index: 1, kind: input, shape index: {}]   ;;  %s641_s5 = inlined_call_operand.vmem [shape: f32[1,32], index: 5, kind: input, shape index: {}]   ;;  %s642_s0 = inlined_call_operand.vmem [shape: bf16[16,32], index: 0, kind: input, shape index: {}]   ;;  %s643_s3 = inlined_call_operand.vmem [shape: f32[1,32], index: 3, kind: input, shape index: {}]   ;;  %s644_s7 = inlined_call_operand.vmem [shape: f32[1,8], index: 7, kind: input, shape index: {}]   ;;  %s645_s6 = inlined_call_operand.vmem [shape: bf16[32,8], index: 6, kind: input, shape index: {}]   ;;  %s646_s8 = inlined_call_operand.vmem [shape: bf16[32,33], index: 8, kind: input, shape index: {}]   ;;  %s647_s9 = inlined_call_operand.vmem [shape: f32[1,33], index: 9, kind: input, shape index: {}]   ;;  %s648_s10 = inlined_call_operand.vmem [shape: bf16[32,32], index: 10, kind: input, shape index: {}]   ;;  %s649_s11 = inlined_call_operand.vmem [shape: f32[1,32], index: 11, kind: input, shape index: {}]   ;;  %s650_s12 = inlined_call_operand.vmem [shape: bf16[32,8], index: 12, kind: input, shape index: {}]   ;;  %s651_s14 = inlined_call_operand.vmem [shape: f32[2,8], index: 14, kind: input, shape index: {}]   ;;  %s652_s13 = inlined_call_operand.vmem [shape: f32[1,8], index: 13, kind: input, shape index: {}]   ;;  %s653_s15 = inlined_call_operand.vmem [shape: f32[16,8], index: 15, kind: output, shape index: {}]  }
   0x1   :  { %v100_v0 = vld [vmem:[%s638_s4] sm:$0x3]  ;;  %v439_v1 = vld [vmem:[%s639_s2 + $0x8] sm:$0xff]  ;;  %452 = vset.pattern.permute.xlu2 %v475_v41  ;;  %451 = vset.pattern.permute.xlu1 %v475_v41  ;;  %vm374_vm11 = vcmask 64512  }
   0x2   :  { %v116_v2 = vsel %vm114_vm0, %v100_v0, 0  ;;  %v440_v3 = vld [vmem:[%s640_s1] sm:$0xff]  ;;  %88 = vmatpush.bf16.msra.mxu0 %v439_v1  ;;  %v442_v6 = vld [vmem:[%s645_s6 + $0x8] sm:$0xff]  ;;  %453 = vset.pattern.permute.xlu0 %v475_v41 }
   0x3   :  { %125 = vmatpush.bf16.msra.mxu1 %v116_v2  ;;  %v438_v4 = vld [vmem:[%s639_s2] sm:$0xff]  ;;  %165 = vmatpush.bf16.msra.mxu2 %v442_v6  ;;  %v444_v8 = vld [vmem:[%s646_s8 + $0x8] sm:$0xff] }
   0x4   :  { %v437_v5 = vld [vmem:[%s642_s0] sm:$0xff]  ;;  %202 = vmatpush.bf16.msra.mxu3 %v444_v8  ;;  %v446_v26 = vld [vmem:[%s648_s10 + $0x8] sm:$0xff] }
   0x5   :  { %v441_v7 = vld [vmem:[%s645_s6] sm:$0xff]  ;;  %v448_v42 = vld [vmem:[%s650_s12 + $0x8] sm:$0xff] }
   0x6   :  { %398 = vmatmul.msk.bf16.vlgmr.msra.gmra.mxu1 %vm110_vm1, %v440_v3  ;;  %89 = vmatpush.bf16.msra.mxu0 %v438_v4  ;;  %v443_v9 = vld [vmem:[%s646_s8] sm:$0xff] }
   0x7   :  { %166 = vmatpush.bf16.msra.mxu2 %v441_v7  ;;  %v454_v11 = vld [vmem:[%s641_s5] ss:$0 sm:$0xff]  ;;  %242 = vmatpush.bf16.msrb.mxu1 %v446_v26 }
   0x8   :  { %203 = vmatpush.bf16.msra.mxu3 %v443_v9  ;;  %v455_v14 = vld [vmem:[%s643_s3] ss:$0 sm:$0xff] }
   0x9   :  { %393 = vmatmul.msk.bf16.vlgmr.msra.gmra.mxu0 %vm78_vm2, %v437_v5  ;;  %v445_v27 = vld [vmem:[%s648_s10] sm:$0xff] }
   0xa   :  { %v456_v28 = vld [vmem:[%s644_s7] ss:$0 sm:$0xff]  ;;  %282 = vmatpush.bf16.msrb.mxu0 %v448_v42 }
   0xb   :  { %243 = vmatpush.bf16.msrb.mxu1 %v445_v27  ;;  %v457_v34 = vld [vmem:[%s647_s9] ss:$0 sm:$0xff] }
   0xc   :  { %v447_v46 = vld [vmem:[%s650_s12] sm:$0xff] }
   0xd   :  { %v458_v8 = vld [vmem:[%s649_s11] ss:$0 sm:$0xff] }
   0xe   :  { %283 = vmatpush.bf16.msrb.mxu0 %v447_v46 }
  0x83   :  { %v127_v10 = vpop.f32.mrf.mxu1 }
  0x84   :  { %v128_v13 = vadd.f32 %v454_v11, %v127_v10 }
  0x86   :  { %v91_v12 = vpop.f32.mrf.mxu0  ;;  %v132_v16 = vmax.f32 %v128_v13, 0.0 }
  0x87   :  { %v92_v18 = vadd.f32 %v455_v14, %v91_v12 }
  0x89   :  { %462 = vtanh.f32 %v92_v18 }
  0x8b   :  { %v129_v15 = vpop.f32.mrf.mxu1 }
  0x8c   :  { %v130_v17 = vadd.f32 %v454_v11, %v129_v15 }
  0x8e   :  { %v133_v19 = vmax.f32 %v130_v17, 0.0  ;;  %v93_v20 = vpop.f32.mrf.mxu0 }
  0x8f   :  { %v94_v22 = vadd.f32 %v455_v14, %v93_v20  ;;  %v463_v23 = vpop.eup %462 }
  0x90   :  { %v135_v21 = vpack.c.bf16 %v133_v19, %v132_v16 }
  0x91   :  { %464 = vtanh.f32 %v94_v22  ;;  %v460_v22 = vld [vmem:[%s651_s14 + $0x1] ss:$0 sm:$0xff] }
  0x92   :  { %407 = vmatmul.msk.bf16.vlgmr.msra.gmra.mxu2 %vm78_vm2, %v135_v21  ;;  %v459_v21 = vld [vmem:[%s651_s14] ss:$0 sm:$0xff] }
  0x97   :  { %v465_v24 = vpop.eup %464 }
  0x98   :  { %v134_v25 = vpack.c.bf16 %v465_v24, %v463_v23  ;;  %v461_v24 = vld [vmem:[%s652_s13] ss:$0 sm:$0xff] }
  0x9a   :  { %416 = vmatmul.msk.bf16.vlgmr.msra.gmra.mxu3 %vm78_vm2, %v134_v25 }
 0x115   :  { %v168_v29 = vpop.f32.mrf.mxu2 }
 0x116   :  { %v601_v30 = vadd.f32 %v456_v28, %v168_v29 }
 0x118   :  { %292 = vrot.lane.b32.xlu0 %v601_v30, %s474_s23 }
 0x11d   :  { %v170_v31 = vpop.f32.mrf.mxu2  ;;  %v205_v33 = vpop.f32.mrf.mxu3 }
 0x11e   :  { %v604_v32 = vadd.f32 %v456_v28, %v170_v31  ;;  %v206_v35 = vadd.f32 %v457_v34, %v205_v33 }
 0x120   :  { %294 = vrot.lane.b32.xlu0 %v604_v32, %s474_s23  ;;  %v210_v38 = vmax.f32 %v206_v35, 0.0 }
 0x125   :  { %v207_v36 = vpop.f32.mrf.mxu3 }
 0x126   :  { %v208_v37 = vadd.f32 %v457_v34, %v207_v36 }
 0x128   :  { %v211_v39 = vmax.f32 %v208_v37, 0.0 }
 0x12a   :  { %v212_v40 = vpack.c.bf16 %v211_v39, %v210_v38 }
 0x12c   :  { %425 = vmatmul.msk.bf16.vlgmr.msrb.gmra.mxu1 %vm78_vm2, %v212_v40 }
 0x18a   :  { %v293_v43 = vpop.permute.xlu0 %292 }
 0x18b   :  { %v298_v44 = vadd.f32 %v293_v43, %v206_v35 }
 0x18d   :  { %v435_v45 = vmul.f32 -1.442695, %v298_v44 }
 0x18f   :  { %466 = vpow2.f32 %v435_v45 }
 0x192   :  { %v295_v47 = vpop.permute.xlu0 %294 }
 0x193   :  { %v299_v48 = vadd.f32 %v295_v47, %v208_v37 }
 0x195   :  { %v467_v49 = vpop.eup %466  ;;  %v436_v50 = vmul.f32 -1.442695, %v299_v48 }
 0x196   :  { %v306_v51 = vadd.f32 1.0, %v467_v49 }
 0x197   :  { %468 = vpow2.f32 %v436_v50 }
 0x198   :  { %470 = vrcp.f32 %v306_v51  ;;  %v319_v57 = vand.u32 2147483648, %v306_v51  ;;  %v317_v59 = vand.u32 2147483647, %v306_v51  ;;  %vm313_vm4 = vweird.f32 %v306_v51 }
 0x19a   :  { %v320_v62 = vor.u32 1.1754944e-38, %v319_v57  ;;  %vm318_vm6 = vcmp.eq.f32.partialorder %v317_v59, 8.507059e+37 }
 0x19d   :  { %v469_v52 = vpop.eup %468 }
 0x19e   :  { %v471_v53 = vpop.eup %470  ;;  %v307_v54 = vadd.f32 1.0, %v469_v52 }
 0x19f   :  { %v309_v55 = vmul.f32 %v471_v53, %v306_v51  ;;  %vm314_vm3 = vweird.f32 %v471_v53 }
 0x1a0   :  { %472 = vrcp.f32 %v307_v54  ;;  %vm315_vm5 = vmor %vm313_vm4, %vm314_vm3  ;;  %v334_v5 = vand.u32 2147483648, %v307_v54  ;;  %v332_v7 = vand.u32 2147483647, %v307_v54  ;;  %vm328_vm8 = vweird.f32 %v307_v54 }
 0x1a1   :  { %v310_v56 = vsub.f32 1.0, %v309_v55 }
 0x1a2   :  { %v335_v10 = vor.u32 1.1754944e-38, %v334_v5  ;;  %vm333_vm10 = vcmp.eq.f32.partialorder %v332_v7, 8.507059e+37 }
 0x1a3   :  { %v311_v58 = vmul.f32 %v471_v53, %v310_v56 }
 0x1a5   :  { %v312_v60 = vadd.f32 %v471_v53, %v311_v58 }
 0x1a6   :  { %v473_v61 = vpop.eup %472 }
 0x1a7   :  { %v316_v63 = vsel %vm315_vm5, %v471_v53, %v312_v60  ;;  %v324_v0 = vmul.f32 %v473_v61, %v307_v54  ;;  %vm329_vm7 = vweird.f32 %v473_v61 }
 0x1a8   :  { %v321_v1 = vsel %vm318_vm6, %v320_v62, %v316_v63  ;;  %vm330_vm9 = vmor %vm328_vm8, %vm329_vm7 }
 0x1a9   :  { %344 = vperm.xlu2 %452, %v321_v1   ;;  %v338_v2 = vsub.f32 1.0, %v321_v1  ;;  %v325_v3 = vsub.f32 1.0, %v324_v0  ;;  %v245_v4 = vpop.f32.mrf.mxu1 }
 0x1aa   :  { %v246_v13 = vadd.f32 %v458_v8, %v245_v4 }
 0x1ab   :  { %356 = vperm.xlu1 %451, %v338_v2   ;;  %v326_v6 = vmul.f32 %v473_v61, %v325_v3 }
 0x1ac   :  { %v250_v17 = vmax.f32 %v246_v13, 0.0 }
 0x1ad   :  { %v327_v9 = vadd.f32 %v473_v61, %v326_v6 }
 0x1af   :  { %v331_v11 = vsel %vm330_vm9, %v473_v61, %v327_v9 }
 0x1b0   :  { %v336_v12 = vsel %vm333_vm10, %v335_v10, %v331_v11 }
 0x1b1   :  { %v339_v14 = vsub.f32 1.0, %v336_v12  ;;  %349 = vperm.xlu2 %452, %v336_v12   ;;  %v247_v15 = vpop.f32.mrf.mxu1 }
 0x1b2   :  { %v248_v16 = vadd.f32 %v458_v8, %v247_v15 }
 0x1b3   :  { %361 = vperm.xlu1 %451, %v339_v14  }
 0x1b4   :  { %v251_v18 = vmax.f32 %v248_v16, 0.0 }
 0x1b6   :  { %v252_v19 = vpack.c.bf16 %v251_v18, %v250_v17 }
 0x1b8   :  { %434 = vmatmul.msk.bf16.vlgmr.msrb.gmra.mxu0 %vm78_vm2, %v252_v19 }
 0x203   :  { %v345_v25 = vpop.permute.xlu2 %344 }
 0x204   :  { %v352_v31 = vmul.f32 %v345_v25, %v601_v30 }
 0x20b   :  { %v350_v36 = vpop.permute.xlu2 %349 }
 0x20c   :  { %v353_v40 = vmul.f32 %v350_v36, %v604_v32 }
 0x21d   :  { %v357_v20 = vpop.permute.xlu1 %356 }
 0x21e   :  { %v365_v23 = vmul.f32 %v459_v21, %v357_v20 }
 0x220   :  { %v368_v27 = vadd.f32 %v460_v22, %v365_v23 }
 0x225   :  { %v362_v29 = vpop.permute.xlu1 %361 }
 0x226   :  { %v366_v34 = vmul.f32 %v459_v21, %v362_v29 }
 0x228   :  { %v369_v38 = vadd.f32 %v460_v22, %v366_v34 }
 0x235   :  { %v285_v26 = vpop.f32.mrf.mxu0 }
 0x236   :  { %v286_v28 = vadd.f32 %v461_v24, %v285_v26 }
 0x238   :  { %v370_v33 = vmul.f32 %v368_v27, %v286_v28 }
 0x23a   :  { %v372_v35 = vadd.f32 %v370_v33, %v352_v31 }
 0x23c   :  { %375 = vst.msk [vmem:[%s653_s15] sm:$0xff] %vm374_vm11, %v372_v35 }
 0x23d   :  { %v287_v37 = vpop.f32.mrf.mxu0 }
 0x23e   :  { %v288_v39 = vadd.f32 %v461_v24, %v287_v37 }
 0x240   :  { %v371_v41 = vmul.f32 %v369_v38, %v288_v39 }
 0x242   :  { %v373_v42 = vadd.f32 %v371_v41, %v353_v40 }
 0x244   :  { %376 = vst.msk [vmem:[%s653_s15 + $0x8] sm:$0xff] %vm374_vm11, %v373_v42 }

</bundles_post_ra>
